<compile_context>
chip_gen: v6e
topology: v6e:2x2x1
jax: 0.10.0
libtpu: 0.0.40
codegen_flags: <defaults>
</compile_context>

<pallas_src>
import functools

import jax
import jax.numpy as jnp
from jax.experimental import pallas as pl
from jax.experimental.pallas import tpu as pltpu

SUBLANE_PAD = 16      # batch rows padded to a multiple of this (bf16-safe sublane packing)
MAX_TILE_B = 1024     # max batch rows per grid step
SMALL_BATCH = 64      # below this, keep a single tile (grid=(1,))


def _round_up(n: int, m: int) -> int:
    return ((n + m - 1) // m) * m


def _cdiv(a: int, b: int) -> int:
    return (a + b - 1) // b


def _choose_batch_tiling(batch: int):
    """Pick (padded_batch, tile_b).

    * tiny batches: one tile, padded only to a sublane multiple.
    * otherwise: at least 2 tiles (so v7x's two TensorCores can both run) and
      tiles <= MAX_TILE_B, with padding waste bounded by one sublane group.
    """
    bp_min = _round_up(batch, SUBLANE_PAD)
    if bp_min <= SMALL_BATCH:
        return bp_min, bp_min
    num_tiles = max(2, _cdiv(batch, MAX_TILE_B))
    tile_b = _round_up(_cdiv(batch, num_tiles), SUBLANE_PAD)
    tile_b = min(tile_b, MAX_TILE_B)
    bp = _round_up(batch, tile_b)
    return bp, tile_b


def _make_fused_encoder_kernel(num_layers: int, activation):
    """Kernel computing the whole Linear+activation chain on one batch tile.

    Ref order: x_ref, (w0, b0, w1, b1, ...), o_ref.
    Weights are bf16 (as prepared once, outside the per-call path); biases are
    (1, d_out) f32; accumulation / bias / activation run in f32.
    """

    def kernel(*refs):
        x_ref = refs[0]
        o_ref = refs[1 + 2 * num_layers]

        # bf16 cast in-kernel (hidden under the input DMA) -> no second copy of x in HBM.
        h = x_ref[...].astype(jnp.bfloat16)
        act = None
        for layer in range(num_layers):          # static unroll (few layers)
            w_ref = refs[1 + 2 * layer]          # (d_in, d_out) bf16
            b_ref = refs[2 + 2 * layer]          # (1, d_out) f32
            y = jnp.dot(h, w_ref[...], preferred_element_type=jnp.float32)
            y = y + b_ref[...]                   # broadcast bias over batch rows (f32)
            if activation == "sigmoid":
                # sigmoid(y) = 0.5*tanh(0.5*y) + 0.5 : single EUP push per element.
                act = 0.5 * jnp.tanh(0.5 * y) + 0.5
            elif activation == "relu":
                act = jnp.maximum(y, 0.0)
            else:                                # identity / None
                act = y
            if layer < num_layers - 1:
                h = act.astype(jnp.bfloat16)     # skip dead cast on the final layer

        o_ref[...] = act.astype(o_ref.dtype)

    return kernel


def init_encoder_params(key, enc_size, init_size, dtype=jnp.float32):
    """PyTorch nn.Linear default init: U(-1/sqrt(fan_in), 1/sqrt(fan_in)).

    Weights stored as (in, out) so the kernel computes x @ W + b.
    """
    if not enc_size:
        dims = [(init_size, init_size)]
    else:
        dims = [(init_size, enc_size[0])]
        for k in range(len(enc_size) - 1):
            dims.append((enc_size[k], enc_size[k + 1]))

    params = []
    for (d_in, d_out) in dims:
        key, kw, kb = jax.random.split(key, 3)
        bound = 1.0 / jnp.sqrt(jnp.array(d_in, dtype))
        w = jax.random.uniform(kw, (d_in, d_out), dtype, -bound, bound)
        b = jax.random.uniform(kb, (d_out,), dtype, -bound, bound)
        params.append((w, b))
    return params


def prepare_encoder_params(params):
    """One-time parameter prep (hoisted out of the per-call path).

    Casts weights to bf16 for the MXU and reshapes biases to (1, d_out) f32.
    Call this once after init / param update, not per forward call.
    """
    prepped = []
    for (w, b) in params:
        prepped.append((jnp.asarray(w, jnp.bfloat16),
                        jnp.asarray(b, jnp.float32).reshape(1, -1)))
    return prepped


@functools.partial(jax.jit, static_argnames=("activation",))
def encoder_forward(x, prepped_params, *, activation="sigmoid"):
    """Forward pass of the Encoder as a single fused Pallas kernel.

    `prepped_params` must come from `prepare_encoder_params` (bf16 weights,
    (1, d_out) f32 biases), so no per-call conversion work is emitted.
    """
    if activation not in ("sigmoid", "relu", "identity", None):
        raise ValueError(f"unsupported activation: {activation!r}")

    batch, d_in = x.shape
    num_layers = len(prepped_params)
    assert prepped_params[0][0].shape[0] == d_in
    d_out = prepped_params[-1][0].shape[1]

    # --- batch tiling (only axis that is tiled) ------------------------------
    bp, tile_b = _choose_batch_tiling(batch)
    if bp != batch:
        x = jnp.pad(x, ((0, bp - batch), (0, 0)))  # zero rows, sliced off below

    # --- specs: x/out tiled over batch with FULL (unpadded) feature dims; ----
    # --- weights/biases resident (constant block index across the grid). -----
    in_specs = [pl.BlockSpec((tile_b, d_in), lambda i: (i, 0))]
    flat_inputs = [x]
    for (w, b) in prepped_params:
        in_specs.append(pl.BlockSpec(w.shape, lambda i: (0, 0)))
        in_specs.append(pl.BlockSpec(b.shape, lambda i: (0, 0)))
        flat_inputs.extend([w, b])
    out_spec = pl.BlockSpec((tile_b, d_out), lambda i: (i, 0))

    # --- explicit VMEM budget (v7x has 64 MiB physical, 32 MiB scoped default)
    def _vmem_tile_bytes(shape, dtype):
        r, c = shape
        itemsize = jnp.dtype(dtype).itemsize
        pack = max(1, 4 // itemsize)               # sublane packing for sub-32-bit
        return _round_up(r, 8 * pack) * _round_up(c, 128) * itemsize

    resident = _vmem_tile_bytes((tile_b, d_in), x.dtype)
    resident += _vmem_tile_bytes((tile_b, d_out), x.dtype)
    for (w, b) in prepped_params:
        resident += _vmem_tile_bytes(w.shape, w.dtype)
        resident += _vmem_tile_bytes(b.shape, b.dtype)
    # everything is (at most) double-buffered by the pipeline; add scratch headroom.
    vmem_limit = min(64 * 1024 * 1024,
                     max(16 * 1024 * 1024, 2 * resident + 4 * 1024 * 1024))
    # TODO(synk): if resident weights ever approach ~40 MiB (very large enc_size),
    # tile the widest layer over an extra "arbitrary" grid axis instead of keeping
    # every layer resident (v7x's 64 MiB VMEM).

    kernel = _make_fused_encoder_kernel(num_layers, activation)

    out = pl.pallas_call(
        kernel,
        out_shape=jax.ShapeDtypeStruct((bp, d_out), x.dtype),
        grid=(bp // tile_b,),
        in_specs=in_specs,
        out_specs=out_spec,
        compiler_params=pltpu.CompilerParams(
            dimension_semantics=("parallel",),
            vmem_limit_bytes=int(vmem_limit),
        ),
    )(*flat_inputs)

    # Only batch padding (if any) to slice off; feature dims were never padded.
    return out[:batch] if bp != batch else out


if __name__ == "__main__":
    key = jax.random.PRNGKey(0)
    k_data, k_params, k_data2 = jax.random.split(key, 3)

    init_size = 32
    enc_size = (32, 16)

    params = init_encoder_params(k_params, enc_size, init_size)
    prepped = prepare_encoder_params(params)   # one-time prep, hoisted out of per-call path

    def reference(xr, raw_params):
        h = xr
        for (w, b) in raw_params:
            y = jnp.dot(h.astype(jnp.bfloat16), w.astype(jnp.bfloat16),
                        preferred_element_type=jnp.float32) + b
            h = jax.nn.sigmoid(y)
        return h

    # Case 1: tiny batch (single tile, grid=(1,)), as in the module's typical use.
    x1 = jax.random.normal(k_data, (8, init_size), jnp.float32)
    out1 = jax.block_until_ready(encoder_forward(x1, prepped, activation="sigmoid"))
    ref1 = reference(x1, params)
    assert out1.shape == (8, enc_size[-1])
    err1 = float(jnp.max(jnp.abs(out1 - ref1)))
    assert jnp.allclose(out1, ref1, atol=1e-2, rtol=0.0), f"max abs err = {err1}"

    # Case 2: batch large enough to split into >= 2 tiles (v7x: both TensorCores busy).
    x2 = jax.random.normal(k_data2, (96, init_size), jnp.float32)
    out2 = jax.block_until_ready(encoder_forward(x2, prepped, activation="sigmoid"))
    ref2 = reference(x2, params)
    assert out2.shape == (96, enc_size[-1])
    err2 = float(jnp.max(jnp.abs(out2 - ref2)))
    assert jnp.allclose(out2, ref2, atol=1e-2, rtol=0.0), f"max abs err = {err2}"

    print("KERNEL_OK")
</pallas_src>

<mosaic_0001>
module attributes {stable_mosaic.version = 11 : i64} {
  func.func @kernel(%arg0: i32, %arg1: memref<16x32xf32, #tpu.memory_space<vmem>>, %arg2: memref<32x32xbf16, #tpu.memory_space<vmem>>, %arg3: memref<1x32xf32, #tpu.memory_space<vmem>>, %arg4: memref<32x16xbf16, #tpu.memory_space<vmem>>, %arg5: memref<1x16xf32, #tpu.memory_space<vmem>>, %arg6: memref<16x16xf32, #tpu.memory_space<vmem>>) attributes {dimension_semantics = [#tpu.dimension_semantics<parallel>], iteration_bounds = array<i64: 1>, scalar_prefetch = 0 : i64, scratch_operands = 0 : i64, tpu.core_type = #tpu.core_type<tc>, window_params = [{transform_indices = @transform_0, window_bounds = array<i64: 16, 32>}, {pipeline_mode = #tpu.pipeline_mode<synchronous>, transform_indices = @transform_1, window_bounds = array<i64: 32, 32>}, {pipeline_mode = #tpu.pipeline_mode<synchronous>, transform_indices = @transform_2, window_bounds = array<i64: 1, 32>}, {pipeline_mode = #tpu.pipeline_mode<synchronous>, transform_indices = @transform_3, window_bounds = array<i64: 32, 16>}, {pipeline_mode = #tpu.pipeline_mode<synchronous>, transform_indices = @transform_4, window_bounds = array<i64: 1, 16>}, {transform_indices = @transform_5, window_bounds = array<i64: 16, 16>}]} {
    %c0 = arith.constant 0 : index
    %c0_0 = arith.constant 0 : index
    %0 = vector.load %arg1[%c0, %c0_0] : memref<16x32xf32, #tpu.memory_space<vmem>>, vector<16x32xf32>
    %1 = arith.truncf %0 : vector<16x32xf32> to vector<16x32xbf16>
    %c0_1 = arith.constant 0 : index
    %c0_2 = arith.constant 0 : index
    %2 = vector.load %arg2[%c0_1, %c0_2] : memref<32x32xbf16, #tpu.memory_space<vmem>>, vector<32x32xbf16>
    %cst = arith.constant dense<0.000000e+00> : vector<16x32xf32>
    %3 = tpu.matmul %1, %2, %cst {dimension_numbers = #tpu.dot_dimension_numbers<[1], [0], [0], [1], [0, 0, 1, 1], [], []>} : vector<16x32xbf16>, vector<32x32xbf16>, vector<16x32xf32> -> vector<16x32xf32>
    %c0_3 = arith.constant 0 : index
    %c0_4 = arith.constant 0 : index
    %4 = vector.load %arg3[%c0_3, %c0_4] : memref<1x32xf32, #tpu.memory_space<vmem>>, vector<1x32xf32>
    %5 = vector.broadcast %4 : vector<1x32xf32> to vector<16x32xf32>
    %6 = arith.addf %3, %5 : vector<16x32xf32>
    %cst_5 = arith.constant 5.000000e-01 : f32
    %7 = vector.broadcast %cst_5 : f32 to vector<16x32xf32>
    %8 = arith.mulf %7, %6 : vector<16x32xf32>
    %9 = math.tanh %8 : vector<16x32xf32>
    %cst_6 = arith.constant 5.000000e-01 : f32
    %10 = vector.broadcast %cst_6 : f32 to vector<16x32xf32>
    %11 = arith.mulf %10, %9 : vector<16x32xf32>
    %cst_7 = arith.constant 5.000000e-01 : f32
    %12 = vector.broadcast %cst_7 : f32 to vector<16x32xf32>
    %13 = arith.addf %11, %12 : vector<16x32xf32>
    %14 = arith.truncf %13 : vector<16x32xf32> to vector<16x32xbf16>
    %c0_8 = arith.constant 0 : index
    %c0_9 = arith.constant 0 : index
    %15 = vector.load %arg4[%c0_8, %c0_9] : memref<32x16xbf16, #tpu.memory_space<vmem>>, vector<32x16xbf16>
    %cst_10 = arith.constant dense<0.000000e+00> : vector<16x16xf32>
    %16 = tpu.matmul %14, %15, %cst_10 {dimension_numbers = #tpu.dot_dimension_numbers<[1], [0], [0], [1], [0, 0, 1, 1], [], []>} : vector<16x32xbf16>, vector<32x16xbf16>, vector<16x16xf32> -> vector<16x16xf32>
    %c0_11 = arith.constant 0 : index
    %c0_12 = arith.constant 0 : index
    %17 = vector.load %arg5[%c0_11, %c0_12] : memref<1x16xf32, #tpu.memory_space<vmem>>, vector<1x16xf32>
    %18 = vector.broadcast %17 : vector<1x16xf32> to vector<16x16xf32>
    %19 = arith.addf %16, %18 : vector<16x16xf32>
    %cst_13 = arith.constant 5.000000e-01 : f32
    %20 = vector.broadcast %cst_13 : f32 to vector<16x16xf32>
    %21 = arith.mulf %20, %19 : vector<16x16xf32>
    %22 = math.tanh %21 : vector<16x16xf32>
    %cst_14 = arith.constant 5.000000e-01 : f32
    %23 = vector.broadcast %cst_14 : f32 to vector<16x16xf32>
    %24 = arith.mulf %23, %22 : vector<16x16xf32>
    %cst_15 = arith.constant 5.000000e-01 : f32
    %25 = vector.broadcast %cst_15 : f32 to vector<16x16xf32>
    %26 = arith.addf %24, %25 : vector<16x16xf32>
    %c0_16 = arith.constant 0 : index
    %c0_17 = arith.constant 0 : index
    %27 = vector.load %arg6[%c0_16, %c0_17] : memref<16x16xf32, #tpu.memory_space<vmem>>, vector<16x16xf32>
    tpu.vector_store %arg6[%c0_16, %c0_17], %26 {strides = array<i32>} : memref<16x16xf32, #tpu.memory_space<vmem>>, vector<16x16xf32>,
    return
  }
  func.func @transform_0(%arg0: i32) -> (i32, i32) {
    %c0_i32 = arith.constant 0 : i32
    %c0_i32_0 = arith.constant 0 : i32
    return %arg0, %c0_i32 : i32, i32
  }
  func.func @transform_1(%arg0: i32) -> (i32, i32) {
    %c0_i32 = arith.constant 0 : i32
    %c0_i32_0 = arith.constant 0 : i32
    %c0_i32_1 = arith.constant 0 : i32
    return %c0_i32, %c0_i32_0 : i32, i32
  }
  func.func @transform_2(%arg0: i32) -> (i32, i32) {
    %c0_i32 = arith.constant 0 : i32
    %c0_i32_0 = arith.constant 0 : i32
    %c0_i32_1 = arith.constant 0 : i32
    return %c0_i32, %c0_i32_0 : i32, i32
  }
  func.func @transform_3(%arg0: i32) -> (i32, i32) {
    %c0_i32 = arith.constant 0 : i32
    %c0_i32_0 = arith.constant 0 : i32
    %c0_i32_1 = arith.constant 0 : i32
    return %c0_i32, %c0_i32_0 : i32, i32
  }
  func.func @transform_4(%arg0: i32) -> (i32, i32) {
    %c0_i32 = arith.constant 0 : i32
    %c0_i32_0 = arith.constant 0 : i32
    %c0_i32_1 = arith.constant 0 : i32
    return %c0_i32, %c0_i32_0 : i32, i32
  }
  func.func @transform_5(%arg0: i32) -> (i32, i32) {
    %c0_i32 = arith.constant 0 : i32
    %c0_i32_0 = arith.constant 0 : i32
    return %arg0, %c0_i32 : i32, i32
  }
}

</mosaic_0001>

<bundles_post_ra>
// kernel: encoder_forward.1
= control target key start
LH: loop header
LB: loop body
LE: loop exit
PB: predicated region body
PF: predicated region fallthrough
CT: control target
= control target key end

     0   :  { %v227_v0 = vmov 0.0   ;;  %vm228_vm0 = vmmov 0   ;;  %vm47_vm1 = vcmask 261120   ;;  %vm176_vm2 = vcmask 130048   ;;  %s291_s1 = inlined_call_operand.vmem [shape: bf16[32,32], index: 1, kind: input, shape index: {}]   ;;  %s292_s0 = inlined_call_operand.vmem [shape: f32[16,32], index: 0, kind: input, shape index: {}]   ;;  %s293_s3 = inlined_call_operand.vmem [shape: bf16[32,16], index: 3, kind: input, shape index: {}]   ;;  %s294_s2 = inlined_call_operand.vmem [shape: f32[1,32], index: 2, kind: input, shape index: {}]   ;;  %s295_s4 = inlined_call_operand.vmem [shape: f32[1,16], index: 4, kind: input, shape index: {}]   ;;  %s296_s5 = inlined_call_operand.vmem [shape: f32[16,16], index: 5, kind: output, shape index: {}]  }
   0x1   :  { %197 = vmatprep.subr.bf16.mxu0 %v227_v0  ;;  %v215_v1 = vld [vmem:[%s291_s1 + $0x8] sm:$0xff]   ;;  %201 = vmatprep.mubr.msk.bf16.mxu0 %vm228_vm0, %v227_v0  ;;  %v216_v2 = vld [vmem:[%s291_s1] sm:$0xff]  }
   0x2   :  { %205 = vmatprep.subr.bf16.mxu1 %v227_v0  ;;  %209 = vmatprep.mubr.msk.bf16.mxu1 %vm228_vm0, %v227_v0  ;;  %v21_v3 = vld [vmem:[%s292_s0] sm:$0xff]  ;;  %v22_v4 = vld [vmem:[%s292_s0 + $0x8] sm:$0xff] }
   0x3   :  { %198 = vmatpush3.bf16.msra.mxu0 %v215_v1  ;;  %v23_v5 = vpack.c.bf16 %v22_v4, %v21_v3  ;;  %v217_v6 = vld [vmem:[%s293_s3 + $0x8] sm:$0xff]   ;;  %v218_v7 = vld [vmem:[%s293_s3] sm:$0xff]  }
   0x4   :  { %199 = vmatprep.subr.bf16.mxu0 %v227_v0  ;;  %206 = vmatpush3.bf16.msra.mxu1 %v217_v6  ;;  %v183_v8 = vld [vmem:[%s294_s2] ss:$0 sm:$0xff] }
   0x5   :  { %207 = vmatprep.subr.bf16.mxu1 %v227_v0  ;;  %v187_v24 = vld [vmem:[%s295_s4] ss:$0 sm:$0xff] }
   0x7   :  { %200 = vmatpush3.bf16.msra.mxu0 %v216_v2 }
   0x8   :  { %208 = vmatpush3.bf16.msra.mxu1 %v218_v7 }
   0xa   :  { %202 = vmatmul.mubr.msk.bf16.vlgmr.msra.gmra.mxu0 %vm47_vm1, %v23_v5 }
  0xca   :  { %v85_v9 = vpop.f32.mrf.mxu0 }
  0xcb   :  { %v86_v10 = vadd.f32 %v183_v8, %v85_v9 }
  0xcc   :  { %v203_v11 = vpop.f32.mrf.mxu0 }
  0xcd   :  { %v92_v12 = vmul.f32 0.5, %v86_v10 }
  0xce   :  { %v88_v13 = vpop.f32.mrf.mxu0 }
  0xcf   :  { %219 = vtanh.f32 %v92_v12  ;;  %v89_v14 = vadd.f32 %v183_v8, %v88_v13 }
  0xd0   :  { %v204_v15 = vpop.f32.mrf.mxu0 }
  0xd1   :  { %v93_v16 = vmul.f32 0.5, %v89_v14 }
  0xd3   :  { %221 = vtanh.f32 %v93_v16 }
  0xdc   :  { %v220_v17 = vpop.eup %219 }
  0xdd   :  { %v96_v18 = vmul.f32 0.5, %v220_v17 }
  0xdf   :  { %v98_v21 = vadd.f32 0.5, %v96_v18 }
  0xe0   :  { %v222_v19 = vpop.eup %221 }
  0xe1   :  { %v97_v20 = vmul.f32 0.5, %v222_v19 }
  0xe3   :  { %v99_v22 = vadd.f32 0.5, %v97_v20 }
  0xe5   :  { %v100_v23 = vpack.c.bf16 %v99_v22, %v98_v21 }
  0xe7   :  { %210 = vmatmul.mubr.msk.bf16.vlgmr.msra.gmra.mxu1 %vm47_vm1, %v100_v23 }
 0x1a7   :  { %v161_v25 = vpop.f32.mrf.mxu1 }
 0x1a8   :  { %v162_v26 = vadd.f32 %v187_v24, %v161_v25 }
 0x1a9   :  { %v211_v27 = vpop.f32.mrf.mxu1 }
 0x1aa   :  { %v168_v28 = vmul.f32 0.5, %v162_v26 }
 0x1ab   :  { %v164_v29 = vpop.f32.mrf.mxu1 }
 0x1ac   :  { %223 = vtanh.f32 %v168_v28  ;;  %v165_v30 = vadd.f32 %v187_v24, %v164_v29 }
 0x1ad   :  { %v212_v31 = vpop.f32.mrf.mxu1 }
 0x1ae   :  { %v169_v32 = vmul.f32 0.5, %v165_v30 }
 0x1b0   :  { %225 = vtanh.f32 %v169_v32 }
 0x1b9   :  { %v224_v33 = vpop.eup %223 }
 0x1ba   :  { %v172_v34 = vmul.f32 0.5, %v224_v33 }
 0x1bc   :  { %v174_v35 = vadd.f32 0.5, %v172_v34 }
 0x1bd   :  { %v226_v36 = vpop.eup %225 }
 0x1be   :  { %177 = vst.msk [vmem:[%s296_s5] sm:$0xff] %vm176_vm2, %v174_v35  ;;  %v173_v37 = vmul.f32 0.5, %v226_v36 }
 0x1c0   :  { %v175_v38 = vadd.f32 0.5, %v173_v37 }
 0x1c2   :  { %178 = vst.msk [vmem:[%s296_s5 + $0x8] sm:$0xff] %vm176_vm2, %v175_v38 }

</bundles_post_ra>
